<compile_context>
chip_gen: v5e
topology: v5e:2x2
jax: 0.10.0
libtpu: 0.0.40
codegen_flags: <defaults>
</compile_context>

<pallas_src>
import math

import jax
import jax.numpy as jnp
from jax.experimental import pallas as pl
from jax.experimental.pallas import tpu as pltpu


def _round_up(x, m):
    return ((x + m - 1) // m) * m


def _activation(name):
    return {
        "relu": lambda v: jnp.maximum(v, 0.0),
        "tanh": jnp.tanh,
        "sigmoid": jax.nn.sigmoid,
        "elu": lambda v: jnp.where(v > 0, v, jnp.expm1(jnp.minimum(v, 0.0))),
        "linear": lambda v: v,
    }[name]


def _vmem_capacity_bytes():
    try:
        info = pltpu.get_tpu_info()
        cap = int(getattr(info, "vmem_capacity_bytes", 0))
        if cap > 0:
            return cap
    except Exception:
        pass
    return 64 * 1024 * 1024  # conservative default (v7x per-core VMEM)


# --------------------------------------------------------------------------
# Tile / VMEM budget math — single source of truth for prep and forward.
# --------------------------------------------------------------------------
def _footprint_bytes(tb, tn, h_last, wbytes):
    x_b = tb * h_last * 4          # streamed activations (f32)
    w_b = h_last * tn * wbytes     # streamed weight tile
    b_b = 8 * tn * 4               # bias tile (sublane-padded)
    o_b = tb * tn * 4              # output tile (f32)
    # x2 for double-buffering + extra output-sized headroom for in-kernel temps.
    return 2 * (x_b + w_b + b_b + o_b) + 2 * o_b


def _choose_tiles(h_last, n_grp, a_grp, tb_hint, wbytes, vmem_cap):
    budget = int(vmem_cap * 0.70)              # ~45 MiB on 64 MiB, ~90 MiB on 128 MiB
    tb_cap = 256 if vmem_cap >= (96 << 20) else 128
    tb = min(tb_cap, _round_up(max(tb_hint, 8), 8))

    base = (128 * a_grp) // math.gcd(128, a_grp)   # lcm(128, alphabet group)
    n_base_pad = _round_up(n_grp, base)

    def tn_for(tb_):
        fixed = 2 * tb_ * h_last * 4
        per_tn = 2 * (h_last * wbytes + 8 * 4 + tb_ * 4) + 2 * tb_ * 4
        tn_budget = max(base, ((budget - fixed) // per_tn // base) * base)
        # target ~4 MiB of weight bytes per grid step (amortizes step overhead)
        tn_target = max(base, _round_up((4 << 20) // max(1, h_last * wbytes), base))
        return max(base, min(n_base_pad, tn_budget, tn_target))

    tn = tn_for(tb)
    while tb > 8 and _footprint_bytes(tb, tn, h_last, wbytes) > budget:
        tb = max(8, tb // 2)
        tn = tn_for(tb)

    # Prefer >=2 weight blocks so megacore (v7x, 2 TCs) can split along N.
    if tn >= n_base_pad and n_base_pad >= 2 * base:
        tn = _round_up(-(-n_base_pad // 2), base)

    n_pad = _round_up(n_grp, tn)
    return tb, tn, n_pad


# --------------------------------------------------------------------------
# Kernel 1: hidden MLP stack (small; weights live as constant-index blocks)
# --------------------------------------------------------------------------
def make_mlp_kernel(num_hidden, first_nl, last_nl):
    fa = _activation(first_nl)
    la = _activation(last_nl)

    def kernel(z_ref, *refs):
        # refs = (W_0, b_0, ..., W_{n-1}, b_{n-1}, out)
        out_ref = refs[-1]
        x = z_ref[...]
        # TODO(synk): train-mode nn.Dropout (stochastic) not implemented;
        #             kernel is eval-mode / dropout_proba=0.0 only.
        for i in range(num_hidden):
            w = refs[2 * i][...]        # (in, out) f32
            b = refs[2 * i + 1][...]    # (1, out) f32
            x = jnp.dot(x, w, preferred_element_type=jnp.float32) + b
            x = fa(x) if i < num_hidden - 1 else la(x)
        out_ref[...] = x

    return kernel


# --------------------------------------------------------------------------
# Kernel 2: tiled output projection + per-position log_softmax (lane-dense)
# --------------------------------------------------------------------------
def make_proj_kernel(a_grp):
    def kernel(x_ref, w_ref, b_ref, o_ref):
        x = x_ref[...]                  # (TB, h_last) f32
        w = w_ref[...]                  # (h_last, TN) streamed weight tile
        logits = jnp.dot(x.astype(w.dtype), w,
                         preferred_element_type=jnp.float32) + b_ref[...]
        tb, tn = logits.shape           # static
        # TN is a multiple of `a_grp`, so each tile holds whole per-position
        # alphabet groups; reduce per group, store lane-dense 2D.
        t = logits.reshape(tb, tn // a_grp, a_grp)
        m = jnp.max(t, axis=-1, keepdims=True)
        lse = jnp.log(jnp.sum(jnp.exp(t - m), axis=-1, keepdims=True))
        o_ref[...] = (t - (m + lse)).reshape(tb, tn).astype(o_ref.dtype)

    return kernel


# --------------------------------------------------------------------------
# Weight-only preprocessing: call ONCE per parameter update, reuse per forward.
# --------------------------------------------------------------------------
def preprocess_params(params, cfg, weight_dtype=jnp.bfloat16, batch_hint=None):
    seq_len = cfg["seq_len"]
    alphabet = cfg["alphabet_size"]
    hls = cfg["hidden_layers_sizes"]
    h_last = hls[-1]

    # Effective W_out: reproduce the torch .view()/mm conv-fold + sparsity
    # gating exactly (including their row-major reinterpretations).
    channel = cfg["convolution_depth"] if cfg["convolve_output"] else alphabet
    w_out = jnp.asarray(params["W_out"], jnp.float32)       # (channel*S, h_last)
    if cfg["convolve_output"]:
        conv_w = jnp.asarray(params["conv_weight"], jnp.float32)  # (A, C, 1)
        w_out = jnp.matmul(w_out.reshape(seq_len * h_last, channel),
                           conv_w.reshape(channel, alphabet))
    if cfg["include_sparsity"]:
        sp = jnp.tile(jnp.asarray(params["sparsity_weight"], jnp.float32),
                      (cfg["num_tiles_sparsity"], 1))
        sp = jax.nn.sigmoid(sp)[:, :, None]                  # (h_last, S, 1)
        w_out = w_out.reshape(h_last, seq_len, alphabet) * sp
    w_out = w_out.reshape(seq_len * alphabet, h_last)        # (S*A, h_last)
    b_out = jnp.asarray(params["b_out"], jnp.float32)        # (S*A,)

    # Fold softplus(temperature) into W/b (exact: s*(xW+b) == x(sW)+(sb)).
    if cfg["include_temperature_scaler"]:
        scale = jnp.log1p(jnp.exp(
            jnp.asarray(params["temperature_scaler"], jnp.float32)[0]))
        w_out = w_out * scale
        b_out = b_out * scale

    # Pad each per-position alphabet group to a divisor / multiple of 128 so
    # the in-kernel group reduce is lane-aligned (no relayouts). Padded
    # columns: zero weights + very negative bias so softmax ignores them.
    if alphabet <= 128:
        a_grp = alphabet if 128 % alphabet == 0 else (1 << (alphabet - 1).bit_length())
    else:
        a_grp = _round_up(alphabet, 128)
    if a_grp != alphabet:
        NEG = jnp.float32(-1e30)
        w3 = w_out.reshape(seq_len, alphabet, h_last)
        w3 = jnp.pad(w3, ((0, 0), (0, a_grp - alphabet), (0, 0)))
        w_out = w3.reshape(seq_len * a_grp, h_last)
        b2 = jnp.full((seq_len, a_grp), NEG, jnp.float32)
        b2 = b2.at[:, :alphabet].set(b_out.reshape(seq_len, alphabet))
        b_out = b2.reshape(seq_len * a_grp)
    n_grp = seq_len * a_grp

    # Tile selection from the real per-core VMEM capacity.
    vmem_cap = _vmem_capacity_bytes()
    wbytes = jnp.dtype(weight_dtype).itemsize
    tb_hint = batch_hint if batch_hint is not None else 256
    tb, tn, n_pad = _choose_tiles(h_last, n_grp, a_grp, tb_hint, wbytes, vmem_cap)

    w_out_T = jnp.zeros((h_last, n_pad), jnp.float32).at[:, :n_grp].set(w_out.T)
    b_out_p = jnp.zeros((1, n_pad), jnp.float32).at[:, :n_grp].set(b_out[None, :])

    return {
        # Hidden-layer weights stay f32 (tiny; accuracy > bandwidth there).
        "hidden_W": [jnp.asarray(params["hidden_W"][i], jnp.float32).T
                     for i in range(len(hls))],
        "hidden_b": [jnp.asarray(params["hidden_b"][i], jnp.float32).reshape(1, -1)
                     for i in range(len(hls))],
        "w_out_T": w_out_T.astype(weight_dtype),              # (h_last, N_pad)
        "b_out": b_out_p,                                     # (1, N_pad)
        "a_grp": a_grp,
        "n_grp": n_grp,
        "n_pad": n_pad,
        "tb": tb,
        "tn": tn,
        "vmem_cap": vmem_cap,
    }


# --------------------------------------------------------------------------
# Forward
# --------------------------------------------------------------------------
def vae_decoder_forward(z, prep, cfg):
    seq_len = cfg["seq_len"]
    alphabet = cfg["alphabet_size"]
    hls = cfg["hidden_layers_sizes"]
    num_hidden = len(hls)
    h_last = hls[-1]
    z_dim = cfg["z_dim"]
    a_grp = prep["a_grp"]

    bsz = z.shape[0]
    tb = min(prep["tb"], _round_up(bsz, 8))   # never exceeds the budgeted tb
    b_pad = _round_up(bsz, tb)
    z_p = jnp.zeros((b_pad, z_dim), jnp.float32).at[:bsz].set(
        z.astype(jnp.float32))

    # ---- Stage 1: hidden MLP stack (once per batch tile, f32) --------------
    mlp_inputs = [z_p]
    mlp_specs = [pl.BlockSpec((tb, z_dim), lambda i: (i, 0))]
    for li in range(num_hidden):
        w = prep["hidden_W"][li]
        b = prep["hidden_b"][li]
        mlp_inputs += [w, b]
        mlp_specs += [pl.BlockSpec(w.shape, lambda i: (0, 0)),
                      pl.BlockSpec(b.shape, lambda i: (0, 0))]

    x_last = pl.pallas_call(
        make_mlp_kernel(num_hidden, cfg["first_hidden_nonlinearity"],
                        cfg["last_hidden_nonlinearity"]),
        grid=(b_pad // tb,),
        in_specs=mlp_specs,
        out_specs=pl.BlockSpec((tb, h_last), lambda i: (i, 0)),
        out_shape=jax.ShapeDtypeStruct((b_pad, h_last), jnp.float32),
        compiler_params=pltpu.CompilerParams(
            dimension_semantics=("parallel",)),
    )(*mlp_inputs)

    # ---- Stage 2: tiled projection + log_softmax ---------------------------
    # Grid order: weight axis SLOW, batch axis FAST => the (dominant) W_out_T
    # HBM stream is DMA'd exactly once; only the tiny x tile is re-read.
    tn = prep["tn"]
    n_pad = prep["n_pad"]
    w_out_T = prep["w_out_T"]
    b_out = prep["b_out"]
    wbytes = jnp.dtype(w_out_T.dtype).itemsize
    vmem_cap = prep["vmem_cap"]

    fp = _footprint_bytes(tb, tn, h_last, wbytes)
    vmem_limit = int(min(vmem_cap - (8 << 20),
                         max(32 << 20, fp + (8 << 20))))

    nb_n = n_pad // tn
    nb_b = b_pad // tb
    cost = pl.CostEstimate(
        flops=2 * b_pad * h_last * n_pad,
        transcendentals=b_pad * n_pad,
        bytes_accessed=(h_last * n_pad * wbytes          # W streamed once
                        + nb_n * b_pad * h_last * 4      # x re-read per N block
                        + n_pad * 4 + b_pad * n_pad * 4))

    out2d = pl.pallas_call(
        make_proj_kernel(a_grp),
        grid=(nb_n, nb_b),
        in_specs=[
            pl.BlockSpec((tb, h_last), lambda j, i: (i, 0)),
            pl.BlockSpec((h_last, tn), lambda j, i: (0, j)),
            pl.BlockSpec((1, tn), lambda j, i: (0, j)),
        ],
        out_specs=pl.BlockSpec((tb, tn), lambda j, i: (i, j)),
        out_shape=jax.ShapeDtypeStruct((b_pad, n_pad), jnp.float32),
        compiler_params=pltpu.CompilerParams(
            dimension_semantics=("parallel", "parallel"),
            vmem_limit_bytes=vmem_limit),
        cost_estimate=cost,
    )(x_last, w_out_T, b_out)

    out = out2d[:bsz, :].reshape(bsz, n_pad // a_grp, a_grp)
    return out[:, :seq_len, :alphabet]


# --------------------------------------------------------------------------
# Pure-JAX f32 reference mirroring the PyTorch forward (eval mode)
# --------------------------------------------------------------------------
def reference_forward(z, params, cfg):
    hls = cfg["hidden_layers_sizes"]
    fa = _activation(cfg["first_hidden_nonlinearity"])
    la = _activation(cfg["last_hidden_nonlinearity"])
    x = z.astype(jnp.float32)
    for i in range(len(hls)):
        x = x @ params["hidden_W"][i].T + params["hidden_b"][i]
        x = fa(x) if i < len(hls) - 1 else la(x)
    seq_len, alphabet = cfg["seq_len"], cfg["alphabet_size"]
    h_last = hls[-1]
    channel = cfg["convolution_depth"] if cfg["convolve_output"] else alphabet
    w_out = params["W_out"]
    if cfg["convolve_output"]:
        w_out = jnp.matmul(w_out.reshape(seq_len * h_last, channel),
                           params["conv_weight"].reshape(channel, alphabet))
    if cfg["include_sparsity"]:
        sp = jnp.tile(params["sparsity_weight"], (cfg["num_tiles_sparsity"], 1))
        sp = jax.nn.sigmoid(sp)[:, :, None]
        w_out = w_out.reshape(h_last, seq_len, alphabet) * sp
    w_out = w_out.reshape(seq_len * alphabet, h_last)
    x = x @ w_out.T + params["b_out"]
    if cfg["include_temperature_scaler"]:
        x = jnp.log1p(jnp.exp(params["temperature_scaler"][0])) * x
    x = x.reshape(z.shape[0], seq_len, alphabet)
    return jax.nn.log_softmax(x, axis=-1)


def init_params(key, cfg):
    hls = cfg["hidden_layers_sizes"]
    seq_len, alphabet = cfg["seq_len"], cfg["alphabet_size"]
    channel = cfg["convolution_depth"] if cfg["convolve_output"] else alphabet
    h_last = hls[-1]
    mu_bias_init = 0.1

    keys = jax.random.split(key, 4 + len(hls))
    params = {"hidden_W": [], "hidden_b": []}
    in_dim = cfg["z_dim"]
    for i, h in enumerate(hls):
        bound = 1.0 / jnp.sqrt(in_dim)
        params["hidden_W"].append(
            jax.random.uniform(keys[i], (h, in_dim), jnp.float32, -bound, bound))
        params["hidden_b"].append(jnp.full((h,), mu_bias_init, jnp.float32))
        in_dim = h
    fan_in, fan_out = h_last, channel * seq_len
    std = jnp.sqrt(2.0 / (fan_in + fan_out))
    params["W_out"] = std * jax.random.normal(
        keys[len(hls)], (channel * seq_len, h_last), jnp.float32)
    params["b_out"] = jnp.full((alphabet * seq_len,), mu_bias_init, jnp.float32)
    if cfg["convolve_output"]:
        params["conv_weight"] = (1.0 / jnp.sqrt(channel)) * jax.random.normal(
            keys[len(hls) + 1], (alphabet, channel, 1), jnp.float32)
    if cfg["include_sparsity"]:
        params["sparsity_weight"] = jax.random.normal(
            keys[len(hls) + 2],
            (h_last // cfg["num_tiles_sparsity"], seq_len), jnp.float32)
    params["temperature_scaler"] = jnp.ones((1,), jnp.float32)
    return params


if __name__ == "__main__":
    cfg = dict(
        seq_len=8,
        alphabet_size=16,
        hidden_layers_sizes=[32, 64],
        z_dim=16,
        first_hidden_nonlinearity="relu",
        last_hidden_nonlinearity="relu",
        dropout_proba=0.0,
        convolve_output=True,
        convolution_depth=8,
        include_temperature_scaler=True,
        include_sparsity=True,
        num_tiles_sparsity=2,
    )
    key = jax.random.PRNGKey(0)
    k_param, k_z = jax.random.split(key)
    params = init_params(k_param, cfg)
    z = jax.random.normal(k_z, (4, cfg["z_dim"]), jnp.float32)

    ref = jax.block_until_ready(reference_forward(z, params, cfg))

    # Exactness check with f32 weights.
    prep_f32 = preprocess_params(params, cfg, weight_dtype=jnp.float32,
                                 batch_hint=z.shape[0])
    out_f32 = jax.block_until_ready(vae_decoder_forward(z, prep_f32, cfg))
    assert out_f32.shape == (4, cfg["seq_len"], cfg["alphabet_size"])
    assert jnp.allclose(out_f32, ref, rtol=1e-4, atol=1e-4), (
        f"f32 max abs err {jnp.max(jnp.abs(out_f32 - ref))}")

    # Default fast path: bf16-streamed output weights, f32 MXU accumulation.
    prep_bf16 = preprocess_params(params, cfg, weight_dtype=jnp.bfloat16,
                                  batch_hint=z.shape[0])
    out_bf16 = jax.block_until_ready(vae_decoder_forward(z, prep_bf16, cfg))
    assert out_bf16.shape == (4, cfg["seq_len"], cfg["alphabet_size"])
    assert jnp.allclose(out_bf16, ref, rtol=5e-2, atol=5e-2), (
        f"bf16 max abs err {jnp.max(jnp.abs(out_bf16 - ref))}")

    print("KERNEL_OK")
</pallas_src>

<mosaic_0001>
module attributes {stable_mosaic.version = 11 : i64} {
  func.func @kernel(%arg0: i32, %arg1: memref<8x16xf32, #tpu.memory_space<vmem>>, %arg2: memref<16x32xf32, #tpu.memory_space<vmem>>, %arg3: memref<1x32xf32, #tpu.memory_space<vmem>>, %arg4: memref<32x64xf32, #tpu.memory_space<vmem>>, %arg5: memref<1x64xf32, #tpu.memory_space<vmem>>, %arg6: memref<8x64xf32, #tpu.memory_space<vmem>>) attributes {dimension_semantics = [#tpu.dimension_semantics<parallel>], iteration_bounds = array<i64: 1>, scalar_prefetch = 0 : i64, scratch_operands = 0 : i64, tpu.core_type = #tpu.core_type<tc>, window_params = [{transform_indices = @transform_0, window_bounds = array<i64: 8, 16>}, {pipeline_mode = #tpu.pipeline_mode<synchronous>, transform_indices = @transform_1, window_bounds = array<i64: 16, 32>}, {pipeline_mode = #tpu.pipeline_mode<synchronous>, transform_indices = @transform_2, window_bounds = array<i64: 1, 32>}, {pipeline_mode = #tpu.pipeline_mode<synchronous>, transform_indices = @transform_3, window_bounds = array<i64: 32, 64>}, {pipeline_mode = #tpu.pipeline_mode<synchronous>, transform_indices = @transform_4, window_bounds = array<i64: 1, 64>}, {transform_indices = @transform_5, window_bounds = array<i64: 8, 64>}]} {
    %c0 = arith.constant 0 : index
    %c0_0 = arith.constant 0 : index
    %0 = vector.load %arg1[%c0, %c0_0] : memref<8x16xf32, #tpu.memory_space<vmem>>, vector<8x16xf32>
    %c0_1 = arith.constant 0 : index
    %c0_2 = arith.constant 0 : index
    %1 = vector.load %arg2[%c0_1, %c0_2] : memref<16x32xf32, #tpu.memory_space<vmem>>, vector<16x32xf32>
    %c0_3 = arith.constant 0 : index
    %c0_4 = arith.constant 0 : index
    %2 = vector.load %arg3[%c0_3, %c0_4] : memref<1x32xf32, #tpu.memory_space<vmem>>, vector<1x32xf32>
    %cst = arith.constant dense<0.000000e+00> : vector<8x32xf32>
    %3 = tpu.matmul %0, %1, %cst {dimension_numbers = #tpu.dot_dimension_numbers<[1], [0], [0], [1], [0, 0, 1, 1], [], []>} : vector<8x16xf32>, vector<16x32xf32>, vector<8x32xf32> -> vector<8x32xf32>
    %4 = vector.broadcast %2 : vector<1x32xf32> to vector<8x32xf32>
    %5 = arith.addf %3, %4 : vector<8x32xf32>
    %cst_5 = arith.constant 0.000000e+00 : f32
    %6 = vector.broadcast %cst_5 : f32 to vector<8x32xf32>
    %7 = arith.maximumf %5, %6 : vector<8x32xf32>
    %c0_6 = arith.constant 0 : index
    %c0_7 = arith.constant 0 : index
    %8 = vector.load %arg4[%c0_6, %c0_7] : memref<32x64xf32, #tpu.memory_space<vmem>>, vector<32x64xf32>
    %c0_8 = arith.constant 0 : index
    %c0_9 = arith.constant 0 : index
    %9 = vector.load %arg5[%c0_8, %c0_9] : memref<1x64xf32, #tpu.memory_space<vmem>>, vector<1x64xf32>
    %cst_10 = arith.constant dense<0.000000e+00> : vector<8x64xf32>
    %10 = tpu.matmul %7, %8, %cst_10 {dimension_numbers = #tpu.dot_dimension_numbers<[1], [0], [0], [1], [0, 0, 1, 1], [], []>} : vector<8x32xf32>, vector<32x64xf32>, vector<8x64xf32> -> vector<8x64xf32>
    %11 = vector.broadcast %9 : vector<1x64xf32> to vector<8x64xf32>
    %12 = arith.addf %10, %11 : vector<8x64xf32>
    %cst_11 = arith.constant 0.000000e+00 : f32
    %13 = vector.broadcast %cst_11 : f32 to vector<8x64xf32>
    %14 = arith.maximumf %12, %13 : vector<8x64xf32>
    %c0_12 = arith.constant 0 : index
    %c0_13 = arith.constant 0 : index
    %15 = vector.load %arg6[%c0_12, %c0_13] : memref<8x64xf32, #tpu.memory_space<vmem>>, vector<8x64xf32>
    tpu.vector_store %arg6[%c0_12, %c0_13], %14 {strides = array<i32>} : memref<8x64xf32, #tpu.memory_space<vmem>>, vector<8x64xf32>,
    return
  }
  func.func @transform_0(%arg0: i32) -> (i32, i32) {
    %c0_i32 = arith.constant 0 : i32
    %c0_i32_0 = arith.constant 0 : i32
    return %arg0, %c0_i32 : i32, i32
  }
  func.func @transform_1(%arg0: i32) -> (i32, i32) {
    %c0_i32 = arith.constant 0 : i32
    %c0_i32_0 = arith.constant 0 : i32
    %c0_i32_1 = arith.constant 0 : i32
    return %c0_i32, %c0_i32_0 : i32, i32
  }
  func.func @transform_2(%arg0: i32) -> (i32, i32) {
    %c0_i32 = arith.constant 0 : i32
    %c0_i32_0 = arith.constant 0 : i32
    %c0_i32_1 = arith.constant 0 : i32
    return %c0_i32, %c0_i32_0 : i32, i32
  }
  func.func @transform_3(%arg0: i32) -> (i32, i32) {
    %c0_i32 = arith.constant 0 : i32
    %c0_i32_0 = arith.constant 0 : i32
    %c0_i32_1 = arith.constant 0 : i32
    return %c0_i32, %c0_i32_0 : i32, i32
  }
  func.func @transform_4(%arg0: i32) -> (i32, i32) {
    %c0_i32 = arith.constant 0 : i32
    %c0_i32_0 = arith.constant 0 : i32
    %c0_i32_1 = arith.constant 0 : i32
    return %c0_i32, %c0_i32_0 : i32, i32
  }
  func.func @transform_5(%arg0: i32) -> (i32, i32) {
    %c0_i32 = arith.constant 0 : i32
    %c0_i32_0 = arith.constant 0 : i32
    return %arg0, %c0_i32 : i32, i32
  }
}

</mosaic_0001>

<bundles_post_ra>
// kernel: tpu_custom_call.1
= control target key start
LH: loop header
LB: loop body
LE: loop exit
PB: predicated region body
PF: predicated region fallthrough
CT: control target
= control target key end

     0   :  { %10 = vsyncpa [#allocation3], 0  ;;  %s317_s0 = inlined_call_operand.hbm [shape: f32[8,16], index: 0, kind: input, shape index: {}]   ;;  %s318_s1 = inlined_call_operand.hbm [shape: f32[16,32], index: 1, kind: input, shape index: {}]   ;;  %s319_s2 = inlined_call_operand.vmem [shape: f32[1,32], index: 2, kind: input, shape index: {}]   ;;  %s320_s3 = inlined_call_operand.hbm [shape: f32[32,64], index: 3, kind: input, shape index: {}]   ;;  %s321_s4 = inlined_call_operand.vmem [shape: f32[1,64], index: 4, kind: input, shape index: {}]   ;;  %s322_s5 = inlined_call_operand.hbm [shape: f32[8,64], index: 5, kind: output, shape index: {}]  }
   0x1   :  { %11 = vsyncpa [#allocation6], 0  ;;  %s28_s20 = sshll.u32 %s318_s1, 4  ;;  %s29_s20 = int_to_ptr.hbm [resolvable:$true] %s28_s20 }
   0x2   :  { %12 = vsyncpa [#allocation4], 0  ;;  %s263_s21 = smov [#allocation5]   ;;  %s18_s25 = sshll.u32 %s317_s0, 4  ;;  %s19_s25 = int_to_ptr.hbm [resolvable:$true] %s18_s25 }
   0x3   :  { %s30_s22 = sshll.u32 %s263_s21, 4  ;;  %s264_s26 = smov 128   ;;  %s31_s22 = int_to_ptr.vmem [resolvable:$true] %s30_s22 }
   0x4   :  { %s265_s27 = smov 8   ;;  %s266_s28 = smov [#allocation2]  }
   0x5   :  { %36 = dma.hbm_to_vmem [thread:$0]  %s29_s20, 256, %s31_s22, [#allocation6], %s264_s26, %s264_s26, %s265_s27  }
   0x6   :  { %s20_s29 = sshll.u32 %s266_s28, 4  ;;  %s43_s7 = sshll.u32 %s320_s3, 4  ;;  %s21_s29 = int_to_ptr.vmem [resolvable:$true] %s20_s29  ;;  %s44_s7 = int_to_ptr.hbm [resolvable:$true] %s43_s7 }
   0x7   :  { %23 = dma.hbm_to_vmem [thread:$0]  %s19_s25, 128, %s21_s29, [#allocation3]  }
   0x8   :  { %s267_s1 = smov [#allocation7]  }
   0x9   :  { %s45_s8 = sshll.u32 %s267_s1, 4  ;;  %s46_s8 = int_to_ptr.vmem [resolvable:$true] %s45_s8 }
   0xa   :  { %51 = dma.hbm_to_vmem [thread:$0]  %s44_s7, 512, %s46_s8, [#allocation6], %s264_s26, %s264_s26, %s265_s27  }
   0xb   :  { %257 = dma.done.wait [#allocation3], 128  }
   0xc   :  { %258 = vsyncadd [#allocation3], 4294967168 }
   0xd   :  { %259 = dma.done.wait [#allocation6], 768  }
   0xe   :  { %260 = vsyncadd [#allocation6], 4294966528  ;;  %v68_v0 = vld [vmem:[#allocation5 + $0x8] sm:$0xff]  ;;  %v67_v1 = vld [vmem:[#allocation5] sm:$0xff]  ;;  %vm73_vm0 = vcmask 130048   ;;  %vm106_vm1 = vcmask 261120  }
   0xf   :  { %91 = vmatpush.msra.mxu0 %v68_v0  ;;  %v66_v2 = vld [vmem:[#allocation2] sm:$0xff]  ;;  %v101_v3 = vld [vmem:[#allocation7 + $0x18] sm:$0xff]  ;;  %v100_v4 = vld [vmem:[#allocation7 + $0x10] sm:$0xff]  ;;  %s268_s11 = smov [#allocation8]   ;;  %s140_s15 = sshll.u32 %s322_s5, 4  ;;  %vm131_vm2 = vcmask 523264   ;;  %s141_s15 = int_to_ptr.hbm [resolvable:$true] %s140_s15 }
  0x10   :  { %122 = vmatpush.msra.mxu1 %v101_v3  ;;  %v99_v5 = vld [vmem:[#allocation7 + $0x8] sm:$0xff]  ;;  %v98_v6 = vld [vmem:[#allocation7] sm:$0xff]  ;;  %s138_s12 = sshll.u32 %s268_s11, 4  ;;  %s139_s12 = int_to_ptr.vmem [resolvable:$true] %s138_s12 }
  0x11   :  { %92 = vmatpush.msra.mxu0 %v67_v1  ;;  %v159_v7 = vld [vmem:[%s319_s2] ss:$0 sm:$0xff] }
  0x12   :  { %151 = vmatmul.msk.f32.vlgmr.msra.gmra.mxu0 %vm73_vm0, %v66_v2  ;;  %123 = vmatpush.msra.mxu1 %v100_v4  ;;  %v160_v11 = vld [vmem:[%s321_s4] ss:$0 sm:$0xff] }
  0x14   :  { %124 = vmatpush.msra.mxu1 %v99_v5 }
  0x16   :  { %125 = vmatpush.msra.mxu1 %v98_v6 }
  0x8f   :  { %v94_v8 = vpop.f32.mrf.mxu0 }
  0x90   :  { %v95_v9 = vadd.f32 %v159_v7, %v94_v8 }
  0x92   :  { %v97_v10 = vmax.f32 %v95_v9, 0.0 }
  0x94   :  { %152 = vmatmul.msk.f32.vlgmr.msra.gmra.mxu1 %vm106_vm1, %v97_v10 }
 0x111   :  { %v127_v12 = vpop.f32.mrf.mxu1 }
 0x112   :  { %v128_v13 = vadd.f32 %v160_v11, %v127_v12 }
 0x114   :  { %v130_v14 = vmax.f32 %v128_v13, 0.0 }
 0x116   :  { %132 = vst.msk [vmem:[#allocation8] sm:$0xff] %vm131_vm2, %v130_v14 }
 0x117   :  { %143 = dma.vmem_to_hbm [thread:$0]  %s139_s12, 128, %s141_s15, [#allocation4]  }
 0x118   :  { %261 = dma.done.wait [#allocation4], 128  }
 0x119   :  { %262 = vsyncadd [#allocation4], 4294967168 }
 0x11a   :  { %148 = vsyncpa [#allocation3], 1 }
 0x11b   :  { %149 = vsyncpa [#allocation6], 1 }
 0x11c   :  { %150 = vsyncpa [#allocation4], 1 }

</bundles_post_ra>
